<compile_context>
chip_gen: v7x
topology: tpu7x:2x2x1
jax: 0.10.0
libtpu: 0.0.40
codegen_flags: <defaults>
</compile_context>

<pallas_src>
import functools

import jax
import jax.numpy as jnp
from jax import lax
from jax.experimental import pallas as pl
from jax.experimental.pallas import tpu as pltpu

IN_FEATURES = 11
IN_PAD = 16            # layer-1 contraction dim padded (col 11 = bias lane)
HIDDEN = 256
OUT_FEATURES = 10
OUT_PAD = 16           # layer-2 output rows padded for an aligned transpose
LANES = 128
TB_MAX_DEFAULT = 8192  # max batch tile (rows per grid step)
NEG_BIG = -1e30        # bias of padded output rows -> exp() underflows to 0


def _round_up(x, m):
    return ((x + m - 1) // m) * m


def _cdiv(a, b):
    return -(-a // b)


def _chip_config():
    """(bf16_epilogue, vmem_limit_bytes) per TPU generation."""
    try:
        kind = jax.devices()[0].device_kind.lower()
    except Exception:
        kind = ""
    old_vpu = any(t in kind for t in ("v2", "v3", "v4", "v5"))  # no bf16 VALU
    is_v7 = "7" in kind                                         # 64 MiB VMEM/TC
    vmem_limit = (48 if is_v7 else 64) * 1024 * 1024
    return (not old_vpu), vmem_limit


def _pick_tiles(batch, tb_max):
    """Pick (batch tile, padded batch): tile is a multiple of 128, padded
    batch a multiple of the tile, >=2 grid steps, last tile mostly full."""
    bp128 = _round_up(max(batch, 1), LANES)
    if bp128 <= LANES:
        return LANES, LANES
    nsteps = max(2, _cdiv(bp128, max(tb_max, LANES)))
    tb = _round_up(_cdiv(bp128, nsteps), LANES)
    return tb, tb * nsteps


def _mlp_kernel(x_ref, w1_ref, w2_ref, b2_ref, o_ref, *, bf16_epilogue):
    # x : [tb, IN_PAD]       bf16 (col 11 == 1.0, cols 12..15 == 0)
    # w1: [HIDDEN, IN_PAD]   bf16 (col 11 == b1, cols 12..15 == 0)
    # w2: [OUT_PAD, HIDDEN]  bf16 (rows 10..15 == 0)
    # b2: [OUT_PAD, 1]       f32  (rows 10..15 == -1e30)
    # o : [tb, OUT_FEATURES] f32
    #
    # Layer 1 (+ folded bias) on the MXU, bf16 in / f32 accumulate.
    # Contracting the LAST dims keeps x batch-major in HBM; the tiny
    # [tb,16]->[16,tb] transpose is done in-kernel on the XLU.
    acc = lax.dot_general(
        w1_ref[...], x_ref[...],
        dimension_numbers=(((1,), (1,)), ((), ())),
        preferred_element_type=jnp.float32)                    # [HIDDEN, tb]
    if bf16_epilogue:   # v6e / v7x: packed-bf16 VALU -> cheaper ReLU + h path
        h = jnp.maximum(acc.astype(jnp.bfloat16), 0)
    else:               # v5e and older: keep the epilogue in f32
        h = jnp.maximum(acc, 0.0).astype(jnp.bfloat16)
    # Layer 2 on the MXU + f32 bias.
    logits = jnp.dot(w2_ref[...], h,
                     preferred_element_type=jnp.float32) + b2_ref[...]
    # log_softmax over the (padded) feature rows: cheap 16-deep sublane
    # reduce; padded rows carry -1e30 so they contribute exp() == 0.
    m = jnp.max(logits, axis=0, keepdims=True)
    s = logits - m
    lse = jnp.log(jnp.sum(jnp.exp(s), axis=0, keepdims=True))
    lp = s - lse                                               # [OUT_PAD, tb]
    # Store batch-major: aligned [16, tb] -> [tb, 16] XLU transpose, then drop
    # the padded feature rows.  Only this tiny final store is lane-masked.
    o_ref[...] = lp.T[:, :OUT_FEATURES].astype(o_ref.dtype)


def prepare_params(w1, b1, w2, b2):
    """PyTorch nn.Linear layout -> kernel layout (done once).

    w1: [256, 11], b1: [256], w2: [10, 256], b2: [10].
    """
    # Fold b1 into an extra contraction column (matches the input's 1.0 lane).
    w1p = jnp.concatenate(
        [w1.astype(jnp.float32), b1.astype(jnp.float32)[:, None]], axis=1)
    w1p = jnp.pad(w1p, ((0, 0), (0, IN_PAD - (IN_FEATURES + 1)))
                  ).astype(jnp.bfloat16)                       # [256, 16]
    w2p = jnp.pad(w2.astype(jnp.float32),
                  ((0, OUT_PAD - OUT_FEATURES), (0, 0))
                  ).astype(jnp.bfloat16)                       # [16, 256]
    b2p = jnp.pad(b2.astype(jnp.float32), (0, OUT_PAD - OUT_FEATURES),
                  constant_values=NEG_BIG).reshape(OUT_PAD, 1)  # [16, 1]
    return w1p, w2p, b2p


@functools.partial(jax.jit, static_argnames=("tb_max",))
def submodel_forward(x, w1p, w2p, b2p, *, tb_max=TB_MAX_DEFAULT):
    """x: [B, 11] f32 -> [B, 10] f32 log-probabilities."""
    B, F = x.shape
    assert F == IN_FEATURES, f"expected {IN_FEATURES} input features, got {F}"
    bf16_epilogue, vmem_limit = _chip_config()
    tb, bp = _pick_tiles(B, tb_max)

    # Batch-major layout plumbing only (no transpose): append the constant-1
    # bias lane, cast to bf16, zero-pad features 12->16 and batch B->bp.
    xa = jnp.concatenate([x, jnp.ones((B, 1), x.dtype)], axis=1)
    xa = jnp.pad(xa.astype(jnp.bfloat16),
                 ((0, bp - B), (0, IN_PAD - (IN_FEATURES + 1))))

    out = pl.pallas_call(
        functools.partial(_mlp_kernel, bf16_epilogue=bf16_epilogue),
        out_shape=jax.ShapeDtypeStruct((bp, OUT_FEATURES), jnp.float32),
        grid=(bp // tb,),
        in_specs=[
            pl.BlockSpec((tb, IN_PAD), lambda i: (i, 0)),           # x tile
            pl.BlockSpec((HIDDEN, IN_PAD), lambda i: (0, 0)),       # w1 resident
            pl.BlockSpec((OUT_PAD, HIDDEN), lambda i: (0, 0)),      # w2 resident
            pl.BlockSpec((OUT_PAD, 1), lambda i: (0, 0)),           # b2 resident
        ],
        out_specs=pl.BlockSpec((tb, OUT_FEATURES), lambda i: (i, 0)),
        compiler_params=pltpu.CompilerParams(
            dimension_semantics=("parallel",),   # v7x dual-TC batch sharding
            vmem_limit_bytes=vmem_limit,
        ),
    )(xa, w1p, w2p, b2p)

    return out if bp == B else out[:B]


def init_params(key):
    """nn.Linear default init (uniform +/- 1/sqrt(fan_in)), PyTorch layout."""
    k1, k2, k3, k4 = jax.random.split(key, 4)
    bound1 = 1.0 / (IN_FEATURES ** 0.5)
    bound2 = 1.0 / (HIDDEN ** 0.5)
    w1 = jax.random.uniform(k1, (HIDDEN, IN_FEATURES), jnp.float32, -bound1, bound1)
    b1 = jax.random.uniform(k2, (HIDDEN,), jnp.float32, -bound1, bound1)
    w2 = jax.random.uniform(k3, (OUT_FEATURES, HIDDEN), jnp.float32, -bound2, bound2)
    b2 = jax.random.uniform(k4, (OUT_FEATURES,), jnp.float32, -bound2, bound2)
    return w1, b1, w2, b2


def reference_forward(x, w1, b1, w2, b2):
    h = jnp.maximum(x @ w1.T + b1, 0.0)
    logits = h @ w2.T + b2
    return jax.nn.log_softmax(logits, axis=1)


if __name__ == "__main__":
    key = jax.random.PRNGKey(0)
    kx, kp = jax.random.split(key)
    w1, b1, w2, b2 = init_params(kp)
    w1p, w2p, b2p = prepare_params(w1, b1, w2, b2)

    # Cases: single-tile small batch; 2-step grid with batch padding
    # (batch=300 -> 2 tiles of 256); 4-step grid with an "unlucky" batch
    # (batch=413, tile cap 128 -> 4 tiles of 128).
    for batch, tb_max in ((8, TB_MAX_DEFAULT), (300, TB_MAX_DEFAULT), (413, 128)):
        x = jax.random.normal(jax.random.fold_in(kx, batch),
                              (batch, IN_FEATURES), jnp.float32)
        out = jax.block_until_ready(
            submodel_forward(x, w1p, w2p, b2p, tb_max=tb_max))
        ref = reference_forward(x, w1, b1, w2, b2)

        assert out.shape == (batch, OUT_FEATURES)
        row_sums = jnp.sum(jnp.exp(out), axis=1)          # log_softmax sanity
        assert bool(jnp.all(jnp.abs(row_sums - 1.0) < 1e-3))
        # bf16-matmul / f32-accumulate tolerance vs f32 reference
        assert bool(jnp.all(jnp.abs(out - ref) < 5e-2))

    print("KERNEL_OK")
</pallas_src>

<mosaic_0001>
module attributes {stable_mosaic.version = 11 : i64} {
  func.func @_mlp_kernel(%arg0: i32, %arg1: memref<128x16xbf16, #tpu.memory_space<vmem>>, %arg2: memref<256x16xbf16, #tpu.memory_space<vmem>>, %arg3: memref<16x256xbf16, #tpu.memory_space<vmem>>, %arg4: memref<16x1xf32, #tpu.memory_space<vmem>>, %arg5: memref<128x10xf32, #tpu.memory_space<vmem>>) attributes {dimension_semantics = [#tpu.dimension_semantics<parallel>], iteration_bounds = array<i64: 1>, scalar_prefetch = 0 : i64, scratch_operands = 0 : i64, tpu.core_type = #tpu.core_type<tc>, window_params = [{transform_indices = @transform_0, window_bounds = array<i64: 128, 16>}, {pipeline_mode = #tpu.pipeline_mode<synchronous>, transform_indices = @transform_1, window_bounds = array<i64: 256, 16>}, {pipeline_mode = #tpu.pipeline_mode<synchronous>, transform_indices = @transform_2, window_bounds = array<i64: 16, 256>}, {pipeline_mode = #tpu.pipeline_mode<synchronous>, transform_indices = @transform_3, window_bounds = array<i64: 16, 1>}, {transform_indices = @transform_4, window_bounds = array<i64: 128, 10>}]} {
    %c0 = arith.constant 0 : index
    %c0_0 = arith.constant 0 : index
    %0 = vector.load %arg2[%c0, %c0_0] : memref<256x16xbf16, #tpu.memory_space<vmem>>, vector<256x16xbf16>
    %c0_1 = arith.constant 0 : index
    %c0_2 = arith.constant 0 : index
    %1 = vector.load %arg1[%c0_1, %c0_2] : memref<128x16xbf16, #tpu.memory_space<vmem>>, vector<128x16xbf16>
    %cst = arith.constant dense<0.000000e+00> : vector<256x128xf32>
    %2 = tpu.matmul %0, %1, %cst {dimension_numbers = #tpu.dot_dimension_numbers<[1], [1], [0], [0], [0, 0, 1, 0], [], []>} : vector<256x16xbf16>, vector<128x16xbf16>, vector<256x128xf32> -> vector<256x128xf32>
    %3 = arith.truncf %2 : vector<256x128xf32> to vector<256x128xbf16>
    %cst_3 = arith.constant 0.000000e+00 : bf16
    %4 = vector.broadcast %cst_3 : bf16 to vector<256x128xbf16>
    %5 = arith.maximumf %3, %4 : vector<256x128xbf16>
    %c0_4 = arith.constant 0 : index
    %c0_5 = arith.constant 0 : index
    %6 = vector.load %arg3[%c0_4, %c0_5] : memref<16x256xbf16, #tpu.memory_space<vmem>>, vector<16x256xbf16>
    %cst_6 = arith.constant dense<0.000000e+00> : vector<16x128xf32>
    %7 = tpu.matmul %6, %5, %cst_6 {dimension_numbers = #tpu.dot_dimension_numbers<[1], [0], [0], [1], [0, 0, 1, 1], [], []>} : vector<16x256xbf16>, vector<256x128xbf16>, vector<16x128xf32> -> vector<16x128xf32>
    %c0_7 = arith.constant 0 : index
    %c0_8 = arith.constant 0 : index
    %8 = vector.load %arg4[%c0_7, %c0_8] : memref<16x1xf32, #tpu.memory_space<vmem>>, vector<16x1xf32>
    %9 = vector.broadcast %8 : vector<16x1xf32> to vector<16x128xf32>
    %10 = arith.addf %7, %9 : vector<16x128xf32>
    %cst_9 = arith.constant dense<0xFF800000> : vector<128xf32>
    %11 = vector.multi_reduction <maximumf>, %10, %cst_9 [0] : vector<16x128xf32> to vector<128xf32>
    %12 = vector.shape_cast %11 : vector<128xf32> to vector<1x128xf32>
    %13 = vector.broadcast %12 : vector<1x128xf32> to vector<16x128xf32>
    %14 = arith.subf %10, %13 : vector<16x128xf32>
    %15 = math.exp %14 : vector<16x128xf32>
    %cst_10 = arith.constant dense<0.000000e+00> : vector<128xf32>
    %16 = vector.multi_reduction <add>, %15, %cst_10 [0] : vector<16x128xf32> to vector<128xf32>
    %17 = vector.shape_cast %16 : vector<128xf32> to vector<1x128xf32>
    %18 = math.log %17 : vector<1x128xf32>
    %19 = vector.broadcast %18 : vector<1x128xf32> to vector<16x128xf32>
    %20 = arith.subf %14, %19 : vector<16x128xf32>
    %21 = tpu.transpose %20, [1, 0] : vector<16x128xf32> -> vector<128x16xf32>
    %22 = vector.extract_strided_slice %21 {offsets = [0, 0], sizes = [128, 10], strides = [1, 1]} : vector<128x16xf32> to vector<128x10xf32>
    %c0_11 = arith.constant 0 : index
    %c0_12 = arith.constant 0 : index
    %23 = vector.load %arg5[%c0_11, %c0_12] : memref<128x10xf32, #tpu.memory_space<vmem>>, vector<128x10xf32>
    tpu.vector_store %arg5[%c0_11, %c0_12], %22 {strides = array<i32>} : memref<128x10xf32, #tpu.memory_space<vmem>>, vector<128x10xf32>,
    return
  }
  func.func @transform_0(%arg0: i32) -> (i32, i32) {
    %c0_i32 = arith.constant 0 : i32
    %c0_i32_0 = arith.constant 0 : i32
    return %arg0, %c0_i32 : i32, i32
  }
  func.func @transform_1(%arg0: i32) -> (i32, i32) {
    %c0_i32 = arith.constant 0 : i32
    %c0_i32_0 = arith.constant 0 : i32
    %c0_i32_1 = arith.constant 0 : i32
    return %c0_i32, %c0_i32_0 : i32, i32
  }
  func.func @transform_2(%arg0: i32) -> (i32, i32) {
    %c0_i32 = arith.constant 0 : i32
    %c0_i32_0 = arith.constant 0 : i32
    %c0_i32_1 = arith.constant 0 : i32
    return %c0_i32, %c0_i32_0 : i32, i32
  }
  func.func @transform_3(%arg0: i32) -> (i32, i32) {
    %c0_i32 = arith.constant 0 : i32
    %c0_i32_0 = arith.constant 0 : i32
    %c0_i32_1 = arith.constant 0 : i32
    return %c0_i32, %c0_i32_0 : i32, i32
  }
  func.func @transform_4(%arg0: i32) -> (i32, i32) {
    %c0_i32 = arith.constant 0 : i32
    %c0_i32_0 = arith.constant 0 : i32
    return %arg0, %c0_i32 : i32, i32
  }
}

</mosaic_0001>

<bundles_post_ra>
// kernel: submodel_forward.1
= control target key start
LH: loop header
LB: loop body
LE: loop exit
PB: predicated region body
PF: predicated region fallthrough
CT: control target
= control target key end

     0   :  { %9 = vsyncpa [#allocation3], 0  ;;  %s1148_s0 = inlined_call_operand.hbm [shape: bf16[128,16], index: 0, kind: input, shape index: {}]   ;;  %s1149_s1 = inlined_call_operand.hbm [shape: bf16[256,16], index: 1, kind: input, shape index: {}]   ;;  %s1150_s2 = inlined_call_operand.hbm [shape: bf16[16,256], index: 2, kind: input, shape index: {}]   ;;  %s1151_s3 = inlined_call_operand.hbm [shape: f32[16,1], index: 3, kind: input, shape index: {}]   ;;  %s1152_s4 = inlined_call_operand.hbm [shape: f32[128,10], index: 4, kind: output, shape index: {}]  }
   0x1   :  { %10 = vsyncpa [#allocation6], 0 }
   0x2   :  { %11 = vsyncpa [#allocation9], 0 }
   0x3   :  { %12 = vsyncpa [#allocation4], 0  ;;  %s972_s15 = smov [#allocation5]   ;;  %s973_s17 = smov [#allocation2]  }
   0x4   :  { %s30_s16 = sshll.u32 %s972_s15, 4  ;;  %s18_s18 = sshll.u32 %s973_s17, 4  ;;  %s31_s16 = int_to_ptr.vmem [resolvable:$true] %s30_s16  ;;  %s1007_s18 = int_to_ptr.vmem [resolvable:$true] %s18_s18 }
   0x5   :  { %s854_s21 = scalar_lea.hbm %s1149_s1, 2048 }
   0x6   :  { %p855_p0 = scmp.ne.s32.totalorder %s1149_s1, %s854_s21  ;;  %p858_p1 = scmp.lt.u32.totalorder %s854_s21, %s1149_s1 }
   0x8   :  { %p860_p2 = pnand %p858_p1, %p855_p0 }
   0xa   :  { %863 = shalt.err (!%p860_p2)
}
   0xb   :  { %s864_s26 = scalar_lea.vmem %s31_s16, 2048  ;;  %p869_p4 = scmp.lt.s32.totalorder %s31_s16, %s31_s16 }
   0xc   :  { %p865_p3 = scmp.ne.s32.totalorder %s31_s16, %s864_s26  ;;  %p870_p5 = scmp.lt.s32.totalorder %s864_s26, %s864_s26 }
   0xe   :  { %p871_p6 = por %p870_p5, %p869_p4 }
  0x10   :  { %p872_p7 = pnand %p871_p6, %p865_p3 }
  0x12   :  { %875 = shalt.err (!%p872_p7)
}
  0x13   :  { %s974_s27 = smov 64   ;;  %s975_s28 = smov 4  }
  0x14   :  { %36 = dma.hbm_to_vmem [thread:$0]  %s1149_s1, 2048, %s31_s16, [#allocation6], %s974_s27, %s974_s27, %s975_s28  }
  0x15   :  { %s876_s7 = scalar_lea.hbm %s1148_s0, 1024 }
  0x16   :  { %p877_p8 = scmp.ne.s32.totalorder %s1148_s0, %s876_s7  ;;  %p880_p9 = scmp.lt.u32.totalorder %s876_s7, %s1148_s0 }
  0x18   :  { %p882_p10 = pnand %p880_p9, %p877_p8 }
  0x1a   :  { %885 = shalt.err (!%p882_p10)
}
  0x1b   :  { %s886_s12 = scalar_lea.vmem %s1007_s18, 1024  ;;  %p891_p12 = scmp.lt.s32.totalorder %s1007_s18, %s1007_s18 }
  0x1c   :  { %p887_p11 = scmp.ne.s32.totalorder %s1007_s18, %s886_s12  ;;  %p892_p13 = scmp.lt.s32.totalorder %s886_s12, %s886_s12 }
  0x1e   :  { %p893_p0 = por %p892_p13, %p891_p12 }
  0x20   :  { %p894_p1 = pnand %p893_p0, %p887_p11 }
  0x22   :  { %897 = shalt.err (!%p894_p1)
}
  0x23   :  { %24 = dma.hbm_to_vmem [thread:$0]  %s1148_s0, 1024, %s1007_s18, [#allocation3], %s974_s27, %s974_s27, %s975_s28  }
  0x24   :  { %s976_s14 = smov [#allocation7]   ;;  %s898_s19 = scalar_lea.hbm %s1150_s2, 256 }
  0x25   :  { %s42_s15 = sshll.u32 %s976_s14, 4  ;;  %p899_p2 = scmp.ne.s32.totalorder %s1150_s2, %s898_s19  ;;  %s43_s15 = int_to_ptr.vmem [resolvable:$true] %s42_s15 }
  0x26   :  { %p902_p3 = scmp.lt.u32.totalorder %s898_s19, %s1150_s2 }
  0x28   :  { %p904_p4 = pnand %p902_p3, %p899_p2 }
  0x2a   :  { %907 = shalt.err (!%p904_p4)
}
  0x2b   :  { %s908_s24 = scalar_lea.vmem %s43_s15, 256  ;;  %p913_p6 = scmp.lt.s32.totalorder %s43_s15, %s43_s15 }
  0x2c   :  { %p909_p5 = scmp.ne.s32.totalorder %s43_s15, %s908_s24  ;;  %p914_p7 = scmp.lt.s32.totalorder %s908_s24, %s908_s24 }
  0x2e   :  { %p915_p8 = por %p914_p7, %p913_p6 }
  0x30   :  { %p916_p9 = pnand %p915_p8, %p909_p5 }
  0x32   :  { %919 = shalt.err (!%p916_p9)
}
  0x33   :  { %s977_s0 = smov 128   ;;  %s978_s18 = smov 8  }
  0x34   :  { %48 = dma.hbm_to_vmem [thread:$0]  %s1150_s2, 256, %s43_s15, [#allocation6], %s977_s0, %s977_s0, %s978_s18  }
  0x35   :  { %s979_s27 = smov [#allocation8]   ;;  %s920_s5 = scalar_lea.hbm %s1151_s3, 256 }
  0x36   :  { %s54_s28 = sshll.u32 %s979_s27, 4  ;;  %p921_p10 = scmp.ne.s32.totalorder %s1151_s3, %s920_s5  ;;  %s55_s28 = int_to_ptr.vmem [resolvable:$true] %s54_s28 }
  0x37   :  { %p924_p11 = scmp.lt.u32.totalorder %s920_s5, %s1151_s3 }
  0x39   :  { %p926_p12 = pnand %p924_p11, %p921_p10 }
  0x3b   :  { %929 = shalt.err (!%p926_p12)
}
  0x3c   :  { %s930_s10 = scalar_lea.vmem %s55_s28, 256  ;;  %p935_p0 = scmp.lt.s32.totalorder %s55_s28, %s55_s28 }
  0x3d   :  { %p931_p13 = scmp.ne.s32.totalorder %s55_s28, %s930_s10  ;;  %p936_p1 = scmp.lt.s32.totalorder %s930_s10, %s930_s10 }
  0x3f   :  { %p937_p2 = por %p936_p1, %p935_p0 }
  0x41   :  { %p938_p3 = pnand %p937_p2, %p931_p13 }
  0x43   :  { %941 = shalt.err (!%p938_p3)
}
  0x44   :  { %60 = dma.hbm_to_vmem [thread:$0]  %s1151_s3, 256, %s55_s28, [#allocation9], %s977_s0, %s977_s0, %s978_s18  }
  0x45   :  { %964 = dma.done.wait [#allocation3], 1024  }
  0x46   :  { %965 = vsyncadd [#allocation3], 4294966272 }
  0x47   :  { %966 = dma.done.wait [#allocation6], 2304  }
  0x48   :  { %967 = vsyncadd [#allocation6], 4294964992 }
  0x49   :  { %968 = dma.done.wait [#allocation9], 256  }
  0x4a   :  { %969 = vsyncadd [#allocation9], 4294967040  ;;  %vm242_vm0 = vcmask 130048   ;;  %v821_v0 = vld [vmem:[#allocation2] sm:$0xff]   ;;  %v822_v1 = vld [vmem:[#allocation2 + $0x8] sm:$0xff]   ;;  %v980_v32 = vmov 0  }
  0x4b   :  { %801 = vmatprep.subr.msk.bf16.mxu0 %vm242_vm0, %v821_v0  ;;  %v292_v2 = vsel %vm242_vm0, %v821_v0, 0  ;;  %v823_v3 = vld [vmem:[#allocation2 + $0x10] sm:$0xff]   ;;  %v295_v4 = vsel %vm242_vm0, %v822_v1, 0  ;;  %v829_v5 = vld [vmem:[#allocation5] sm:$0xff]   ;;  %v824_v7 = vld [vmem:[#allocation2 + $0x18] sm:$0xff]   ;;  %820 = vset.pattern.permute.xlu0 %v980_v32  ;;  %vm629_vm1 = vcmask 80896  }
  0x4c   :  { %754 = vmatpush3.bf16.xpose.msra.mxu0 %v292_v2  ;;  %769 = vmatprep.mubr.msk.bf16.mxu0 %vm242_vm0, %v829_v5  ;;  %v298_v6 = vsel %vm242_vm0, %v823_v3, 0  ;;  %v301_v8 = vsel %vm242_vm0, %v824_v7, 0  ;;  %v825_v9 = vld [vmem:[#allocation2 + $0x20] sm:$0xff]   ;;  %v826_v11 = vld [vmem:[#allocation2 + $0x28] sm:$0xff]   ;;  %v827_v13 = vld [vmem:[#allocation2 + $0x30] sm:$0xff]   ;;  %s981_s3 = smov [#allocation10]  }
  0x4d   :  { %802 = vmatprep.subr.msk.bf16.mxu0 %vm242_vm0, %v822_v1  ;;  %v304_v10 = vsel %vm242_vm0, %v825_v9, 0  ;;  %v307_v12 = vsel %vm242_vm0, %v826_v11, 0  ;;  %v310_v14 = vsel %vm242_vm0, %v827_v13, 0  ;;  %v828_v15 = vld [vmem:[#allocation2 + $0x38] sm:$0xff]   ;;  %v830_v17 = vld [vmem:[#allocation5 + $0x8] sm:$0xff]   ;;  %v831_v18 = vld [vmem:[#allocation5 + $0x10] sm:$0xff]  }
  0x4e   :  { %v313_v16 = vsel %vm242_vm0, %v828_v15, 0  ;;  %v832_v19 = vld [vmem:[#allocation5 + $0x18] sm:$0xff]   ;;  %v833_v20 = vld [vmem:[#allocation5 + $0x20] sm:$0xff]   ;;  %v834_v21 = vld [vmem:[#allocation5 + $0x28] sm:$0xff]   ;;  %s651_s12 = sshll.u32 %s981_s3, 4  ;;  %s652_s12 = int_to_ptr.vmem [resolvable:$true] %s651_s12 }
  0x4f   :  { %v835_v22 = vld [vmem:[#allocation5 + $0x30] sm:$0xff]   ;;  %v836_v23 = vld [vmem:[#allocation5 + $0x38] sm:$0xff]   ;;  %v837_v24 = vld [vmem:[#allocation5 + $0x40] sm:$0xff]   ;;  %s942_s1 = scalar_lea.vmem %s652_s12, 2048  ;;  %p947_p5 = scmp.lt.s32.totalorder %s652_s12, %s652_s12 }
  0x50   :  { %v838_v25 = vld [vmem:[#allocation5 + $0x48] sm:$0xff]   ;;  %v839_v26 = vld [vmem:[#allocation5 + $0x50] sm:$0xff]   ;;  %v840_v27 = vld [vmem:[#allocation5 + $0x58] sm:$0xff]   ;;  %p943_p4 = scmp.ne.s32.totalorder %s652_s12, %s942_s1  ;;  %p948_p6 = scmp.lt.s32.totalorder %s942_s1, %s942_s1 }
  0x51   :  { %v841_v28 = vld [vmem:[#allocation5 + $0x60] sm:$0xff]   ;;  %v842_v29 = vld [vmem:[#allocation5 + $0x68] sm:$0xff]   ;;  %v843_v30 = vld [vmem:[#allocation5 + $0x70] sm:$0xff]  }
  0x52   :  { %v844_v31 = vld [vmem:[#allocation5 + $0x78] sm:$0xff]   ;;  %v847_v33 = vld [vmem:[#allocation7 + $0x4] ss:$8 sps:$4 sm:$0xff]   ;;  %v510_v34 = vld [vmem:[#allocation8] sm:$0xff]  ;;  %p949_p7 = por %p948_p6, %p947_p5 }
  0x53   :  { %564 = vmatprep.mubr.bf16.mxu1 %v847_v33  ;;  %514 = vperm.xlu0 %820, %v510_v34   ;;  %v511_v35 = vld [vmem:[#allocation8 + $0x8] sm:$0xff] }
  0x54   :  { %756 = vmatpush3.bf16.xpose.msra.mxu0 %v295_v4  ;;  %p950_p8 = pnand %p949_p7, %p943_p4 }
  0x55   :  { %803 = vmatprep.subr.msk.bf16.mxu0 %vm242_vm0, %v823_v3 }
  0x57   :  { %519 = vperm.xlu0 %820, %v511_v35  }
  0x5c   :  { %758 = vmatpush3.bf16.xpose.msra.mxu0 %v298_v6 }
  0x5d   :  { %804 = vmatprep.subr.msk.bf16.mxu0 %vm242_vm0, %v824_v7 }
  0x64   :  { %760 = vmatpush3.bf16.xpose.msra.mxu0 %v301_v8 }
  0x65   :  { %805 = vmatprep.subr.msk.bf16.mxu0 %vm242_vm0, %v825_v9 }
  0x6c   :  { %762 = vmatpush3.bf16.xpose.msra.mxu0 %v304_v10 }
  0x6d   :  { %806 = vmatprep.subr.msk.bf16.mxu0 %vm242_vm0, %v826_v11 }
  0x74   :  { %764 = vmatpush3.bf16.xpose.msra.mxu0 %v307_v12 }
  0x75   :  { %807 = vmatprep.subr.msk.bf16.mxu0 %vm242_vm0, %v827_v13 }
  0x7c   :  { %766 = vmatpush3.bf16.xpose.msra.mxu0 %v310_v14 }
  0x7d   :  { %808 = vmatprep.subr.msk.bf16.mxu0 %vm242_vm0, %v828_v15 }
  0x84   :  { %768 = vmatpush3.bf16.xpose.msra.mxu0 %v313_v16 }
  0x8b   :  { %770 = vmatmul.mubr.msk.bf16.vlgmr.msra.gmra.mrb[0].mxu0 %vm242_vm0, %v830_v17 }
  0x8c   :  { %773 = vmatprep.mubr.msk.bf16.mxu0 %vm242_vm0, %v831_v18 }
  0x93   :  { %774 = vmatmul.mubr.msk.bf16.gmra.mrb[4].mxu0 %vm242_vm0, %v832_v19 }
  0x94   :  { %777 = vmatprep.mubr.msk.bf16.mxu0 %vm242_vm0, %v833_v20 }
  0x9b   :  { %778 = vmatmul.mubr.msk.bf16.gmra.mrb[8].mxu0 %vm242_vm0, %v834_v21 }
  0x9c   :  { %781 = vmatprep.mubr.msk.bf16.mxu0 %vm242_vm0, %v835_v22 }
  0xa3   :  { %782 = vmatmul.mubr.msk.bf16.gmra.mrb[12].mxu0 %vm242_vm0, %v836_v23 }
  0xa4   :  { %785 = vmatprep.mubr.msk.bf16.mxu0 %vm242_vm0, %v837_v24 }
  0xab   :  { %786 = vmatmul.mubr.msk.bf16.gmra.mrb[16].mxu0 %vm242_vm0, %v838_v25 }
  0xac   :  { %789 = vmatprep.mubr.msk.bf16.mxu0 %vm242_vm0, %v839_v26 }
  0xb3   :  { %790 = vmatmul.mubr.msk.bf16.gmra.mrb[20].mxu0 %vm242_vm0, %v840_v27 }
  0xb4   :  { %793 = vmatprep.mubr.msk.bf16.mxu0 %vm242_vm0, %v841_v28 }
  0xbb   :  { %794 = vmatmul.mubr.msk.bf16.gmra.mrb[24].mxu0 %vm242_vm0, %v842_v29 }
  0xbc   :  { %797 = vmatprep.mubr.msk.bf16.mxu0 %vm242_vm0, %v843_v30 }
  0xc3   :  { %798 = vmatmul.mubr.msk.bf16.gmra.mrb[28].mxu0 %vm242_vm0, %v844_v31 }
 0x15e   :  { %v771_v36 = vpop.f32.mrb[0].mxu0 }
 0x15f   :  { %v349_v37 = vpop.f32.mrb[1].mxu0 }
 0x160   :  { %v772_v38 = vpop.f32.mrb[2].mxu0 }
 0x161   :  { %v477_v39 = vpack.c.bf16 %v772_v38, %v771_v36  ;;  %v352_v40 = vpop.f32.mrb[3].mxu0  ;;  %v515_v38 = vpop.permute.xlu0 %514 }
 0x162   :  { %v476_v41 = vpack.c.bf16 %v352_v40, %v349_v37  ;;  %v845_v37 = vld [vmem:[#allocation7] ss:$8 sps:$4 sm:$0xff]  }
 0x163   :  { %v493_v8 = vmax.bf16 %v980_v32, %v477_v39 }
 0x164   :  { %v492_v3 = vmax.bf16 %v980_v32, %v476_v41 }
 0x166   :  { %v775_v42 = vpop.f32.mrb[4].mxu0 }
 0x167   :  { %v365_v43 = vpop.f32.mrb[5].mxu0 }
 0x168   :  { %v776_v44 = vpop.f32.mrb[6].mxu0 }
 0x169   :  { %v479_v45 = vpack.c.bf16 %v776_v44, %v775_v42  ;;  %v368_v46 = vpop.f32.mrb[7].mxu0 }
 0x16a   :  { %v478_v47 = vpack.c.bf16 %v368_v46, %v365_v43 }
 0x16b   :  { %v495_v18 = vmax.bf16 %v980_v32, %v479_v45  ;;  %v520_v45 = vpop.permute.xlu0 %519 }
 0x16c   :  { %v494_v13 = vmax.bf16 %v980_v32, %v478_v47 }
 0x16e   :  { %v779_v48 = vpop.f32.mrb[8].mxu0 }
 0x16f   :  { %v381_v49 = vpop.f32.mrb[9].mxu0 }
 0x170   :  { %v780_v50 = vpop.f32.mrb[10].mxu0 }
 0x171   :  { %v481_v51 = vpack.c.bf16 %v780_v50, %v779_v48  ;;  %v384_v52 = vpop.f32.mrb[11].mxu0 }
 0x172   :  { %v480_v53 = vpack.c.bf16 %v384_v52, %v381_v49 }
 0x173   :  { %v497_v28 = vmax.bf16 %v980_v32, %v481_v51 }
 0x174   :  { %v496_v23 = vmax.bf16 %v980_v32, %v480_v53 }
 0x176   :  { %v783_v54 = vpop.f32.mrb[12].mxu0 }
 0x177   :  { %v397_v55 = vpop.f32.mrb[13].mxu0 }
 0x178   :  { %v784_v56 = vpop.f32.mrb[14].mxu0 }
 0x179   :  { %v483_v57 = vpack.c.bf16 %v784_v56, %v783_v54  ;;  %v400_v58 = vpop.f32.mrb[15].mxu0 }
 0x17a   :  { %v482_v59 = vpack.c.bf16 %v400_v58, %v397_v55 }
 0x17b   :  { %v499_v36 = vmax.bf16 %v980_v32, %v483_v57 }
 0x17c   :  { %v498_v34 = vmax.bf16 %v980_v32, %v482_v59 }
 0x17e   :  { %v787_v60 = vpop.f32.mrb[16].mxu0 }
 0x17f   :  { %v413_v61 = vpop.f32.mrb[17].mxu0 }
 0x180   :  { %v788_v62 = vpop.f32.mrb[18].mxu0 }
 0x181   :  { %v485_v63 = vpack.c.bf16 %v788_v62, %v787_v60  ;;  %v416_v0 = vpop.f32.mrb[19].mxu0 }
 0x182   :  { %v484_v1 = vpack.c.bf16 %v416_v0, %v413_v61 }
 0x183   :  { %v501_v4 = vmax.bf16 %v980_v32, %v485_v63 }
 0x184   :  { %v500_v2 = vmax.bf16 %v980_v32, %v484_v1 }
 0x186   :  { %v791_v5 = vpop.f32.mrb[20].mxu0  ;;  %731 = vmatprep.subr.bf16.mxu1 %v500_v2 }
 0x187   :  { %v429_v6 = vpop.f32.mrb[21].mxu0  ;;  %732 = vmatpush3.bf16.msra.mxu1 %v492_v3 }
 0x188   :  { %v792_v7 = vpop.f32.mrb[22].mxu0  ;;  %733 = vmatprep.subr.bf16.mxu1 %v501_v4 }
 0x189   :  { %v487_v9 = vpack.c.bf16 %v792_v7, %v791_v5  ;;  %v432_v10 = vpop.f32.mrb[23].mxu0 }
 0x18a   :  { %v486_v11 = vpack.c.bf16 %v432_v10, %v429_v6 }
 0x18b   :  { %734 = vmatpush3.bf16.msra.mxu1 %v493_v8  ;;  %v503_v14 = vmax.bf16 %v980_v32, %v487_v9 }
 0x18c   :  { %v502_v12 = vmax.bf16 %v980_v32, %v486_v11 }
 0x18e   :  { %v795_v15 = vpop.f32.mrb[24].mxu0  ;;  %735 = vmatprep.subr.bf16.mxu1 %v502_v12 }
 0x18f   :  { %v445_v16 = vpop.f32.mrb[25].mxu0  ;;  %736 = vmatpush3.bf16.msra.mxu1 %v494_v13 }
 0x190   :  { %v796_v17 = vpop.f32.mrb[26].mxu0  ;;  %737 = vmatprep.subr.bf16.mxu1 %v503_v14 }
 0x191   :  { %v489_v19 = vpack.c.bf16 %v796_v17, %v795_v15  ;;  %v448_v20 = vpop.f32.mrb[27].mxu0 }
 0x192   :  { %v488_v21 = vpack.c.bf16 %v448_v20, %v445_v16 }
 0x193   :  { %738 = vmatpush3.bf16.msra.mxu1 %v495_v18  ;;  %v505_v24 = vmax.bf16 %v980_v32, %v489_v19 }
 0x194   :  { %v504_v22 = vmax.bf16 %v980_v32, %v488_v21 }
 0x196   :  { %v799_v25 = vpop.f32.mrb[28].mxu0  ;;  %739 = vmatprep.subr.bf16.mxu1 %v504_v22 }
 0x197   :  { %v461_v26 = vpop.f32.mrb[29].mxu0  ;;  %740 = vmatpush3.bf16.msra.mxu1 %v496_v23 }
 0x198   :  { %v800_v27 = vpop.f32.mrb[30].mxu0  ;;  %741 = vmatprep.subr.bf16.mxu1 %v505_v24 }
 0x199   :  { %v491_v29 = vpack.c.bf16 %v800_v27, %v799_v25  ;;  %v464_v30 = vpop.f32.mrb[31].mxu0 }
 0x19a   :  { %v490_v31 = vpack.c.bf16 %v464_v30, %v461_v26 }
 0x19b   :  { %742 = vmatpush3.bf16.msra.mxu1 %v497_v28  ;;  %v507_v35 = vmax.bf16 %v980_v32, %v491_v29 }
 0x19c   :  { %v506_v33 = vmax.bf16 %v980_v32, %v490_v31 }
 0x19e   :  { %743 = vmatprep.subr.bf16.mxu1 %v506_v33 }
 0x19f   :  { %744 = vmatpush3.bf16.msra.mxu1 %v498_v34 }
 0x1a0   :  { %745 = vmatprep.subr.bf16.mxu1 %v507_v35 }
 0x1a3   :  { %746 = vmatpush3.bf16.msra.mxu1 %v499_v36 }
 0x1a6   :  { %565 = vmatmul.mubr.bf16.vlgmr.msra.gmra.mrb[0].mxu1 %v845_v37 }
 0x279   :  { %v747_v39 = vpop.f32.mrb[0].mxu1 }
 0x27a   :  { %v748_v40 = vpop.f32.mrb[1].mxu1 }
 0x27b   :  { %v749_v41 = vadd.f32 %v748_v40, %v747_v39  ;;  %v750_v42 = vpop.f32.mrb[2].mxu1 }
 0x27c   :  { %v751_v43 = vpop.f32.mrb[3].mxu1 }
 0x27d   :  { %v752_v44 = vadd.f32 %v751_v43, %v750_v42  ;;  %v567_v46 = vadd.f32 %v749_v41, %v515_v38 }
 0x27f   :  { %v570_v47 = vadd.f32 %v752_v44, %v520_v45 }
 0x281   :  { %v573_v48 = vmax.f32 %v567_v46, %v570_v47 }
 0x283   :  { %v574_v49 = vrot.slane %v573_v48, 4 }
 0x285   :  { %v575_v50 = vmax.f32 %v573_v48, %v574_v49 }
 0x287   :  { %v576_v51 = vrot.slane %v575_v50, 2 }
 0x289   :  { %v577_v52 = vmax.f32 %v575_v50, %v576_v51 }
 0x28b   :  { %v578_v53 = vrot.slane %v577_v52, 1 }
 0x28d   :  { %v579_v32 = vmax.f32 %v577_v52, %v578_v53 }
 0x28f   :  { %v580_v54 = vsub.f32 %v567_v46, %v579_v32  ;;  %v581_v55 = vsub.f32 %v570_v47, %v579_v32 }
 0x291   :  { %v582_v56 = vmul.f32 1.442695, %v580_v54  ;;  %v584_v57 = vmul.f32 1.442695, %v581_v55 }
 0x293   :  { %848 = vpow2.f32 %v582_v56 }
 0x294   :  { %850 = vpow2.f32 %v584_v57 }
 0x29d   :  { %v849_v58 = vpop.eup %848 }
 0x29e   :  { %v851_v59 = vpop.eup %850 }
 0x29f   :  { %v586_v60 = vadd.f32 %v851_v59, %v849_v58 }
 0x2a1   :  { %v587_v61 = vrot.slane %v586_v60, 4 }
 0x2a3   :  { %v588_v62 = vadd.f32 %v587_v61, %v586_v60 }
 0x2a5   :  { %v589_v63 = vrot.slane %v588_v62, 2 }
 0x2a7   :  { %v590_v0 = vadd.f32 %v589_v63, %v588_v62 }
 0x2a9   :  { %v591_v1 = vrot.slane %v590_v0, 1 }
 0x2ab   :  { %v592_v2 = vadd.f32 %v591_v1, %v590_v0 }
 0x2ad   :  { %852 = vlog2.f32 %v592_v2 }
 0x2b7   :  { %v853_v3 = vpop.eup %852 }
 0x2b8   :  { %v594_v4 = vmul.f32 0.6931472, %v853_v3 }
 0x2ba   :  { %v595_v5 = vsub.f32 %v580_v54, %v594_v4  ;;  %v596_v6 = vsub.f32 %v581_v55, %v594_v4 }
 0x2bc   :  { %597 = vxpose.xlu1.b32.start [1/2] (short) %v595_v5, 128 }
 0x2c0   :  { %598 = vxpose.xlu1.b32.end [2/2] (short) %v596_v6, 128 }
 0x33c   :  { %v613_v7 = vpop.trf.xlu1 }
 0x33d   :  { %630 = vst.msk [vmem:[#allocation10] sm:$0xff] %vm629_vm1, %v613_v7 }
 0x340   :  { %v614_v8 = vpop.trf.xlu1 }
 0x341   :  { %631 = vst.msk [vmem:[#allocation10 + $0x8] sm:$0xff] %vm629_vm1, %v614_v8 }
 0x344   :  { %v615_v9 = vpop.trf.xlu1 }
 0x345   :  { %632 = vst.msk [vmem:[#allocation10 + $0x10] sm:$0xff] %vm629_vm1, %v615_v9 }
 0x348   :  { %v616_v10 = vpop.trf.xlu1 }
 0x349   :  { %633 = vst.msk [vmem:[#allocation10 + $0x18] sm:$0xff] %vm629_vm1, %v616_v10 }
 0x34c   :  { %v617_v11 = vpop.trf.xlu1 }
 0x34d   :  { %634 = vst.msk [vmem:[#allocation10 + $0x20] sm:$0xff] %vm629_vm1, %v617_v11 }
 0x350   :  { %v618_v12 = vpop.trf.xlu1 }
 0x351   :  { %635 = vst.msk [vmem:[#allocation10 + $0x28] sm:$0xff] %vm629_vm1, %v618_v12 }
 0x354   :  { %v619_v13 = vpop.trf.xlu1 }
 0x355   :  { %636 = vst.msk [vmem:[#allocation10 + $0x30] sm:$0xff] %vm629_vm1, %v619_v13 }
 0x358   :  { %v620_v14 = vpop.trf.xlu1 }
 0x359   :  { %637 = vst.msk [vmem:[#allocation10 + $0x38] sm:$0xff] %vm629_vm1, %v620_v14 }
 0x35c   :  { %v621_v15 = vpop.trf.xlu1 }
 0x35d   :  { %638 = vst.msk [vmem:[#allocation10 + $0x40] sm:$0xff] %vm629_vm1, %v621_v15 }
 0x360   :  { %v622_v16 = vpop.trf.xlu1 }
 0x361   :  { %639 = vst.msk [vmem:[#allocation10 + $0x48] sm:$0xff] %vm629_vm1, %v622_v16 }
 0x364   :  { %v623_v17 = vpop.trf.xlu1 }
 0x365   :  { %640 = vst.msk [vmem:[#allocation10 + $0x50] sm:$0xff] %vm629_vm1, %v623_v17 }
 0x368   :  { %v624_v18 = vpop.trf.xlu1 }
 0x369   :  { %641 = vst.msk [vmem:[#allocation10 + $0x58] sm:$0xff] %vm629_vm1, %v624_v18 }
 0x36c   :  { %v625_v19 = vpop.trf.xlu1 }
 0x36d   :  { %642 = vst.msk [vmem:[#allocation10 + $0x60] sm:$0xff] %vm629_vm1, %v625_v19 }
 0x370   :  { %v626_v20 = vpop.trf.xlu1 }
 0x371   :  { %643 = vst.msk [vmem:[#allocation10 + $0x68] sm:$0xff] %vm629_vm1, %v626_v20 }
 0x374   :  { %v627_v21 = vpop.trf.xlu1 }
 0x375   :  { %644 = vst.msk [vmem:[#allocation10 + $0x70] sm:$0xff] %vm629_vm1, %v627_v21 }
 0x378   :  { %v628_v22 = vpop.trf.xlu1 }
 0x379   :  { %645 = vst.msk [vmem:[#allocation10 + $0x78] sm:$0xff] %vm629_vm1, %v628_v22 }
 0x37a   :  { %953 = shalt.err (!%p950_p8)
}
 0x37b   :  { %s954_s15 = scalar_lea.hbm %s1152_s4, 2048 }
 0x37c   :  { %p955_p9 = scmp.ne.s32.totalorder %s1152_s4, %s954_s15  ;;  %p958_p10 = scmp.lt.u32.totalorder %s954_s15, %s1152_s4 }
 0x37e   :  { %p960_p11 = pnand %p958_p10, %p955_p9 }
 0x380   :  { %963 = shalt.err (!%p960_p11)
}
 0x381   :  { %657 = dma.vmem_to_hbm [thread:$0]  %s652_s12, 2048, %s1152_s4, [#allocation4], %s977_s0, %s977_s0, %s978_s18  }
 0x382   :  { %970 = dma.done.wait [#allocation4], 2048  }
 0x383   :  { %971 = vsyncadd [#allocation4], 4294965248 }
 0x384   :  { %661 = vsyncpa [#allocation3], 1 }
 0x385   :  { %662 = vsyncpa [#allocation6], 1 }
 0x386   :  { %663 = vsyncpa [#allocation9], 1 }
 0x387   :  { %664 = vsyncpa [#allocation4], 1 }

</bundles_post_ra>
